<compile_context>
chip_gen: v5e
topology: v5e:2x2
jax: 0.10.0
libtpu: 0.0.40
codegen_flags: <defaults>
</compile_context>

<pallas_src>
import functools

import jax
import jax.numpy as jnp
from jax.experimental import pallas as pl
from jax.experimental.pallas import tpu as pltpu

LN_EPS = 1e-5  # PyTorch nn.LayerNorm default


def _round_up(x, m):
    return ((x + m - 1) // m) * m


def _layernorm(h, gamma, beta):
    # f32 LayerNorm (biased variance, eps=1e-5) — matches torch.nn.LayerNorm.
    mu = jnp.mean(h, axis=-1, keepdims=True)
    var = jnp.mean(jnp.square(h - mu), axis=-1, keepdims=True)
    return (h - mu) * jax.lax.rsqrt(var + LN_EPS) * gamma + beta


def attention_kernel(x_ref, w1_ref, w2_ref, p1_ref, p2_ref, o_ref, *, ch, n_chunks):
    # Per-feature params + weights: read once per grid step, hoisted out of the
    # chunk loop (they live in a handful of vregs; broadcasts over sublanes are
    # replicated-layout, i.e. free, inside the loop).
    b1 = p1_ref[0:1, :]
    g1 = p1_ref[1:2, :]
    be1 = p1_ref[2:3, :]
    b2 = p2_ref[0:1, :]
    g2 = p2_ref[1:2, :]
    be2 = p2_ref[2:3, :]
    w3_row = p2_ref[3:4, :]            # (1, 32)
    b3 = p2_ref[4:5, 0:1]              # (1, 1)
    w1 = w1_ref[...]                   # (D, 64) bf16
    w2 = w2_ref[...]                   # (64, 32) bf16

    def chunk_body(c, carry):
        row = c * ch
        if not isinstance(row, int):
            row = pl.multiple_of(row, ch)

        # Stream one CH-row chunk; cast to bf16 in-kernel (VPU slack).
        xc = x_ref[pl.ds(row, ch), :].astype(jnp.bfloat16)        # (ch, D)

        # FC1 (MXU, bf16 in / f32 acc) -> ReLU -> LayerNorm(64), f32.
        h1 = jnp.dot(xc, w1, preferred_element_type=jnp.float32) + b1
        h1 = _layernorm(jnp.maximum(h1, 0.0), g1, be1)

        # FC2 (MXU, bf16 in / f32 acc) -> ReLU -> LayerNorm(32), f32.
        h2 = jnp.dot(h1.astype(jnp.bfloat16), w2,
                     preferred_element_type=jnp.float32) + b2
        h2 = _layernorm(jnp.maximum(h2, 0.0), g2, be2)

        # FC3 (32 -> 1): contract the 32-wide feature dim of w3 (1,32) against
        # h2 (ch,32) so the result lands lane-dense as (1, ch).
        q = jax.lax.dot_general(
            w3_row, h2,
            dimension_numbers=(((1,), (1,)), ((), ())),
            preferred_element_type=jnp.float32) + b3               # (1, ch)

        # Lane-dense, full-width store: chunk c -> output row c.
        o_ref[pl.ds(c, 1), :] = jax.nn.sigmoid(q)
        return carry

    if n_chunks == 1:
        chunk_body(0, 0)
    else:
        jax.lax.fori_loop(0, n_chunks, chunk_body, 0)


def attention_forward(thought, params, *, max_tile=8192, chunk=256):
    B, D = thought.shape

    # Tile sizing:
    #  - small batches: one grid step, tile = padded batch (all blocks == full
    #    array, always layout-legal).
    #  - large batches: tile is a multiple of 8*chunk (so the chunked output
    #    block keeps an 8-aligned sublane dim) and the grid has >= 2 steps
    #    (megacore on v7x).
    cap = max(8 * chunk, _round_up(max_tile, 8 * chunk))
    if B <= 8 * chunk:
        TB = _round_up(B, 16) if B <= chunk else _round_up(B, chunk)
    else:
        TB = min(cap, _round_up(pl.cdiv(B, 2), 8 * chunk))
    CH = min(chunk, TB)
    B_pad = _round_up(B, TB)
    G = B_pad // TB
    n_chunks = TB // CH
    out_rows = B_pad // CH

    # No wrapper-side dtype passes over x; pad only when the batch is ragged.
    x = thought
    if B_pad != B:
        x = jnp.pad(x, ((0, B_pad - B), (0, 0)))

    # Matmul weights in bf16 (tiny, one-time); per-feature params stay f32,
    # packed into two small arrays to cut per-step DMA descriptors.
    w1_bf = params["w1"].astype(jnp.bfloat16)
    w2_bf = params["w2"].astype(jnp.bfloat16)
    p1 = jnp.concatenate([params["b1"], params["g1"], params["be1"]], axis=0)      # (3, 64)
    w3_row = params["w3"].T                                                        # (1, 32)
    b3_pad = jnp.pad(params["b3"], ((0, 0), (0, 32 - params["b3"].shape[1])))      # (1, 32)
    p2 = jnp.concatenate([params["b2"], params["g2"], params["be2"],
                          w3_row, b3_pad], axis=0)                                 # (5, 32)

    const_map = lambda i: (0, 0)   # weights/params resident across grid steps

    itemsize = thought.dtype.itemsize
    cost = pl.CostEstimate(
        flops=2 * B_pad * (D * 64 + 64 * 32 + 32),
        transcendentals=3 * B_pad,                       # sigmoid + 2x rsqrt per row
        bytes_accessed=B_pad * D * itemsize + B_pad * 4
                       + (D * 64 + 64 * 32) * 2 + (3 * 64 + 5 * 32) * 4,
    )

    out = pl.pallas_call(
        functools.partial(attention_kernel, ch=CH, n_chunks=n_chunks),
        out_shape=jax.ShapeDtypeStruct((out_rows, CH), jnp.float32),
        grid=(G,),
        in_specs=[
            pl.BlockSpec((TB, D), lambda i: (i, 0)),   # streamed activations (incoming dtype)
            pl.BlockSpec((D, 64), const_map),          # W1 (bf16)
            pl.BlockSpec((64, 32), const_map),         # W2 (bf16)
            pl.BlockSpec((3, 64), const_map),          # packed layer-1 params
            pl.BlockSpec((5, 32), const_map),          # packed layer-2 params + w3 + b3
        ],
        out_specs=pl.BlockSpec((n_chunks, CH), lambda i: (i, 0)),   # lane-dense output
        compiler_params=pltpu.CompilerParams(
            dimension_semantics=("parallel",),         # megacore sharding on v7x
        ),
        cost_estimate=cost,
    )(x, w1_bf, w2_bf, p1, p2)

    # (out_rows, CH) flattens in exactly global-row order; slice off padding.
    return out.reshape(B_pad, 1)[:B]


def init_params(key, dim_thought):
    ks = jax.random.split(key, 6)

    def lin(kw, kb, fan_in, fan_out):
        bound = float(fan_in) ** -0.5   # PyTorch nn.Linear default init bound
        w = jax.random.uniform(kw, (fan_in, fan_out), jnp.float32, -bound, bound)
        b = jax.random.uniform(kb, (1, fan_out), jnp.float32, -bound, bound)
        return w, b

    w1, b1 = lin(ks[0], ks[1], dim_thought, 64)
    w2, b2 = lin(ks[2], ks[3], 64, 32)
    w3, b3 = lin(ks[4], ks[5], 32, 1)

    return {
        "w1": w1, "b1": b1,
        "g1": jnp.ones((1, 64), jnp.float32), "be1": jnp.zeros((1, 64), jnp.float32),
        "w2": w2, "b2": b2,
        "g2": jnp.ones((1, 32), jnp.float32), "be2": jnp.zeros((1, 32), jnp.float32),
        "w3": w3, "b3": b3,
    }


def attention_reference(thought, p):
    # Pure-JAX f32 reference of the PyTorch forward.
    h1 = jnp.maximum(thought @ p["w1"] + p["b1"], 0.0)
    h1 = _layernorm(h1, p["g1"], p["be1"])
    h2 = jnp.maximum(h1 @ p["w2"] + p["b2"], 0.0)
    h2 = _layernorm(h2, p["g2"], p["be2"])
    return jax.nn.sigmoid(h2 @ p["w3"] + p["b3"])


if __name__ == "__main__":
    dim_thought = 32
    key = jax.random.PRNGKey(0)
    k_x, k_p = jax.random.split(key)
    params = init_params(k_p, dim_thought)

    # batch=16: single tile, single chunk (all blocks == full arrays).
    # batch=300: ragged batch -> padding + multi-chunk fori_loop path.
    # batch=2500: multi-step grid (exercises streamed-x / chunked-out index maps).
    for batch in (16, 300, 2500):
        kx = jax.random.fold_in(k_x, batch)
        thought = jax.random.normal(kx, (batch, dim_thought), jnp.float32)
        out = jax.block_until_ready(attention_forward(thought, params))
        ref = attention_reference(thought, params)
        assert out.shape == (batch, 1)
        err = float(jnp.max(jnp.abs(out - ref)))
        # bf16 MXU inputs -> compare against the f32 reference with a loose tolerance.
        assert jnp.allclose(out, ref, atol=2e-2, rtol=2e-2), err

    print("KERNEL_OK")
</pallas_src>

<mosaic_0001>
module attributes {stable_mosaic.version = 11 : i64} {
  func.func @attention_kernel(%arg0: i32, %arg1: memref<16x32xf32, #tpu.memory_space<vmem>>, %arg2: memref<32x64xbf16, #tpu.memory_space<vmem>>, %arg3: memref<64x32xbf16, #tpu.memory_space<vmem>>, %arg4: memref<3x64xf32, #tpu.memory_space<vmem>>, %arg5: memref<5x32xf32, #tpu.memory_space<vmem>>, %arg6: memref<1x16xf32, #tpu.memory_space<vmem>>) attributes {dimension_semantics = [#tpu.dimension_semantics<parallel>], iteration_bounds = array<i64: 1>, scalar_prefetch = 0 : i64, scratch_operands = 0 : i64, tpu.core_type = #tpu.core_type<tc>, window_params = [{transform_indices = @transform_0, window_bounds = array<i64: 16, 32>}, {pipeline_mode = #tpu.pipeline_mode<synchronous>, transform_indices = @transform_1, window_bounds = array<i64: 32, 64>}, {pipeline_mode = #tpu.pipeline_mode<synchronous>, transform_indices = @transform_2, window_bounds = array<i64: 64, 32>}, {pipeline_mode = #tpu.pipeline_mode<synchronous>, transform_indices = @transform_3, window_bounds = array<i64: 3, 64>}, {pipeline_mode = #tpu.pipeline_mode<synchronous>, transform_indices = @transform_4, window_bounds = array<i64: 5, 32>}, {transform_indices = @transform_5, window_bounds = array<i64: 1, 16>}]} {
    %c0 = arith.constant 0 : index
    %c0_0 = arith.constant 0 : index
    %0 = vector.load %arg4[%c0, %c0_0] : memref<3x64xf32, #tpu.memory_space<vmem>>, vector<1x64xf32>
    %c1 = arith.constant 1 : index
    %c0_1 = arith.constant 0 : index
    %1 = vector.load %arg4[%c1, %c0_1] : memref<3x64xf32, #tpu.memory_space<vmem>>, vector<1x64xf32>
    %c2 = arith.constant 2 : index
    %c0_2 = arith.constant 0 : index
    %2 = vector.load %arg4[%c2, %c0_2] : memref<3x64xf32, #tpu.memory_space<vmem>>, vector<1x64xf32>
    %c0_3 = arith.constant 0 : index
    %c0_4 = arith.constant 0 : index
    %3 = vector.load %arg5[%c0_3, %c0_4] : memref<5x32xf32, #tpu.memory_space<vmem>>, vector<1x32xf32>
    %c1_5 = arith.constant 1 : index
    %c0_6 = arith.constant 0 : index
    %4 = vector.load %arg5[%c1_5, %c0_6] : memref<5x32xf32, #tpu.memory_space<vmem>>, vector<1x32xf32>
    %c2_7 = arith.constant 2 : index
    %c0_8 = arith.constant 0 : index
    %5 = vector.load %arg5[%c2_7, %c0_8] : memref<5x32xf32, #tpu.memory_space<vmem>>, vector<1x32xf32>
    %c3 = arith.constant 3 : index
    %c0_9 = arith.constant 0 : index
    %6 = vector.load %arg5[%c3, %c0_9] : memref<5x32xf32, #tpu.memory_space<vmem>>, vector<1x32xf32>
    %c4 = arith.constant 4 : index
    %c0_10 = arith.constant 0 : index
    %7 = vector.load %arg5[%c4, %c0_10] : memref<5x32xf32, #tpu.memory_space<vmem>>, vector<1x1xf32>
    %c0_11 = arith.constant 0 : index
    %c0_12 = arith.constant 0 : index
    %8 = vector.load %arg2[%c0_11, %c0_12] : memref<32x64xbf16, #tpu.memory_space<vmem>>, vector<32x64xbf16>
    %c0_13 = arith.constant 0 : index
    %c0_14 = arith.constant 0 : index
    %9 = vector.load %arg3[%c0_13, %c0_14] : memref<64x32xbf16, #tpu.memory_space<vmem>>, vector<64x32xbf16>
    %c0_15 = arith.constant 0 : index
    %c0_16 = arith.constant 0 : index
    %10 = vector.load %arg1[%c0_15, %c0_16] : memref<16x32xf32, #tpu.memory_space<vmem>>, vector<16x32xf32>
    %11 = arith.truncf %10 : vector<16x32xf32> to vector<16x32xbf16>
    %cst = arith.constant dense<0.000000e+00> : vector<16x64xf32>
    %12 = tpu.matmul %11, %8, %cst {dimension_numbers = #tpu.dot_dimension_numbers<[1], [0], [0], [1], [0, 0, 1, 1], [], []>} : vector<16x32xbf16>, vector<32x64xbf16>, vector<16x64xf32> -> vector<16x64xf32>
    %13 = vector.broadcast %0 : vector<1x64xf32> to vector<16x64xf32>
    %14 = arith.addf %12, %13 : vector<16x64xf32>
    %cst_17 = arith.constant 0.000000e+00 : f32
    %15 = vector.broadcast %cst_17 : f32 to vector<16x64xf32>
    %16 = arith.maximumf %14, %15 : vector<16x64xf32>
    %cst_18 = arith.constant dense<0.000000e+00> : vector<16xf32>
    %17 = vector.multi_reduction <add>, %16, %cst_18 [1] : vector<16x64xf32> to vector<16xf32>
    %18 = vector.shape_cast %17 : vector<16xf32> to vector<16x1xf32>
    %cst_19 = arith.constant 6.400000e+01 : f32
    %19 = vector.broadcast %cst_19 : f32 to vector<16x1xf32>
    %20 = arith.divf %18, %19 : vector<16x1xf32>
    %21 = vector.broadcast %20 : vector<16x1xf32> to vector<16x64xf32>
    %22 = arith.subf %16, %21 : vector<16x64xf32>
    %23 = arith.mulf %22, %22 : vector<16x64xf32>
    %cst_20 = arith.constant dense<0.000000e+00> : vector<16xf32>
    %24 = vector.multi_reduction <add>, %23, %cst_20 [1] : vector<16x64xf32> to vector<16xf32>
    %25 = vector.shape_cast %24 : vector<16xf32> to vector<16x1xf32>
    %cst_21 = arith.constant 6.400000e+01 : f32
    %26 = vector.broadcast %cst_21 : f32 to vector<16x1xf32>
    %27 = arith.divf %25, %26 : vector<16x1xf32>
    %28 = vector.broadcast %20 : vector<16x1xf32> to vector<16x64xf32>
    %29 = arith.subf %16, %28 : vector<16x64xf32>
    %cst_22 = arith.constant 9.99999974E-6 : f32
    %30 = vector.broadcast %cst_22 : f32 to vector<16x1xf32>
    %31 = arith.addf %27, %30 : vector<16x1xf32>
    %32 = math.rsqrt %31 : vector<16x1xf32>
    %33 = vector.broadcast %32 : vector<16x1xf32> to vector<16x64xf32>
    %34 = arith.mulf %29, %33 : vector<16x64xf32>
    %35 = vector.broadcast %1 : vector<1x64xf32> to vector<16x64xf32>
    %36 = arith.mulf %34, %35 : vector<16x64xf32>
    %37 = vector.broadcast %2 : vector<1x64xf32> to vector<16x64xf32>
    %38 = arith.addf %36, %37 : vector<16x64xf32>
    %39 = arith.truncf %38 : vector<16x64xf32> to vector<16x64xbf16>
    %cst_23 = arith.constant dense<0.000000e+00> : vector<16x32xf32>
    %40 = tpu.matmul %39, %9, %cst_23 {dimension_numbers = #tpu.dot_dimension_numbers<[1], [0], [0], [1], [0, 0, 1, 1], [], []>} : vector<16x64xbf16>, vector<64x32xbf16>, vector<16x32xf32> -> vector<16x32xf32>
    %41 = vector.broadcast %3 : vector<1x32xf32> to vector<16x32xf32>
    %42 = arith.addf %40, %41 : vector<16x32xf32>
    %cst_24 = arith.constant 0.000000e+00 : f32
    %43 = vector.broadcast %cst_24 : f32 to vector<16x32xf32>
    %44 = arith.maximumf %42, %43 : vector<16x32xf32>
    %cst_25 = arith.constant dense<0.000000e+00> : vector<16xf32>
    %45 = vector.multi_reduction <add>, %44, %cst_25 [1] : vector<16x32xf32> to vector<16xf32>
    %46 = vector.shape_cast %45 : vector<16xf32> to vector<16x1xf32>
    %cst_26 = arith.constant 3.200000e+01 : f32
    %47 = vector.broadcast %cst_26 : f32 to vector<16x1xf32>
    %48 = arith.divf %46, %47 : vector<16x1xf32>
    %49 = vector.broadcast %48 : vector<16x1xf32> to vector<16x32xf32>
    %50 = arith.subf %44, %49 : vector<16x32xf32>
    %51 = arith.mulf %50, %50 : vector<16x32xf32>
    %cst_27 = arith.constant dense<0.000000e+00> : vector<16xf32>
    %52 = vector.multi_reduction <add>, %51, %cst_27 [1] : vector<16x32xf32> to vector<16xf32>
    %53 = vector.shape_cast %52 : vector<16xf32> to vector<16x1xf32>
    %cst_28 = arith.constant 3.200000e+01 : f32
    %54 = vector.broadcast %cst_28 : f32 to vector<16x1xf32>
    %55 = arith.divf %53, %54 : vector<16x1xf32>
    %56 = vector.broadcast %48 : vector<16x1xf32> to vector<16x32xf32>
    %57 = arith.subf %44, %56 : vector<16x32xf32>
    %cst_29 = arith.constant 9.99999974E-6 : f32
    %58 = vector.broadcast %cst_29 : f32 to vector<16x1xf32>
    %59 = arith.addf %55, %58 : vector<16x1xf32>
    %60 = math.rsqrt %59 : vector<16x1xf32>
    %61 = vector.broadcast %60 : vector<16x1xf32> to vector<16x32xf32>
    %62 = arith.mulf %57, %61 : vector<16x32xf32>
    %63 = vector.broadcast %4 : vector<1x32xf32> to vector<16x32xf32>
    %64 = arith.mulf %62, %63 : vector<16x32xf32>
    %65 = vector.broadcast %5 : vector<1x32xf32> to vector<16x32xf32>
    %66 = arith.addf %64, %65 : vector<16x32xf32>
    %cst_30 = arith.constant dense<0.000000e+00> : vector<1x16xf32>
    %67 = tpu.matmul %6, %66, %cst_30 {dimension_numbers = #tpu.dot_dimension_numbers<[1], [1], [0], [0], [0, 0, 1, 0], [], []>} : vector<1x32xf32>, vector<16x32xf32>, vector<1x16xf32> -> vector<1x16xf32>
    %68 = vector.broadcast %7 : vector<1x1xf32> to vector<1x16xf32>
    %69 = arith.addf %67, %68 : vector<1x16xf32>
    %70 = arith.negf %69 : vector<1x16xf32>
    %71 = math.exp %70 : vector<1x16xf32>
    %cst_31 = arith.constant 1.000000e+00 : f32
    %72 = vector.broadcast %cst_31 : f32 to vector<1x16xf32>
    %73 = arith.addf %72, %71 : vector<1x16xf32>
    %74 = arith.divf %72, %73 : vector<1x16xf32>
    %c0_32 = arith.constant 0 : index
    %c0_33 = arith.constant 0 : index
    %75 = vector.load %arg6[%c0_32, %c0_33] : memref<1x16xf32, #tpu.memory_space<vmem>>, vector<1x16xf32>
    tpu.vector_store %arg6[%c0_32, %c0_33], %74 {strides = array<i32>} : memref<1x16xf32, #tpu.memory_space<vmem>>, vector<1x16xf32>,
    return
  }
  func.func @transform_0(%arg0: i32) -> (i32, i32) {
    %c0_i32 = arith.constant 0 : i32
    %c0_i32_0 = arith.constant 0 : i32
    return %arg0, %c0_i32 : i32, i32
  }
  func.func @transform_1(%arg0: i32) -> (i32, i32) {
    %c0_i32 = arith.constant 0 : i32
    %c0_i32_0 = arith.constant 0 : i32
    %c0_i32_1 = arith.constant 0 : i32
    return %c0_i32, %c0_i32_0 : i32, i32
  }
  func.func @transform_2(%arg0: i32) -> (i32, i32) {
    %c0_i32 = arith.constant 0 : i32
    %c0_i32_0 = arith.constant 0 : i32
    %c0_i32_1 = arith.constant 0 : i32
    return %c0_i32, %c0_i32_0 : i32, i32
  }
  func.func @transform_3(%arg0: i32) -> (i32, i32) {
    %c0_i32 = arith.constant 0 : i32
    %c0_i32_0 = arith.constant 0 : i32
    %c0_i32_1 = arith.constant 0 : i32
    return %c0_i32, %c0_i32_0 : i32, i32
  }
  func.func @transform_4(%arg0: i32) -> (i32, i32) {
    %c0_i32 = arith.constant 0 : i32
    %c0_i32_0 = arith.constant 0 : i32
    %c0_i32_1 = arith.constant 0 : i32
    return %c0_i32, %c0_i32_0 : i32, i32
  }
  func.func @transform_5(%arg0: i32) -> (i32, i32) {
    %c0_i32 = arith.constant 0 : i32
    %c0_i32_0 = arith.constant 0 : i32
    return %arg0, %c0_i32 : i32, i32
  }
}

</mosaic_0001>

<bundles_post_ra>
// kernel: tpu_custom_call.1
= control target key start
LH: loop header
LB: loop body
LE: loop exit
PB: predicated region body
PF: predicated region fallthrough
CT: control target
= control target key end

     0   :  { %s497_s0 = inlined_call_operand.vmem [shape: f32[16,32], index: 0, kind: input, shape index: {}]   ;;  %s498_s1 = inlined_call_operand.vmem [shape: bf16[32,64], index: 1, kind: input, shape index: {}]   ;;  %s499_s2 = inlined_call_operand.vmem [shape: bf16[64,32], index: 2, kind: input, shape index: {}]   ;;  %s500_s3 = inlined_call_operand.vmem [shape: f32[3,64], index: 3, kind: input, shape index: {}]   ;;  %s501_s4 = inlined_call_operand.vmem [shape: f32[5,32], index: 4, kind: input, shape index: {}]   ;;  %s502_s5 = inlined_call_operand.hbm [shape: f32[1,16], index: 5, kind: output, shape index: {}]  }
   0x1   :  { %v340_v0 = vld [vmem:[%s498_s1 + $0x8] sm:$0xff]  ;;  %v339_v1 = vld [vmem:[%s498_s1] sm:$0xff] }
   0x2   :  { %v42_v2 = vld [vmem:[%s497_s0] sm:$0xff]  ;;  %v43_v3 = vld [vmem:[%s497_s0 + $0x8] sm:$0xff]  ;;  %68 = vmatpush.bf16.msra.mxu0 %v340_v0 }
   0x3   :  { %10 = vsyncpa [#allocation3], 0  ;;  %v44_v4 = vpack.c.bf16 %v43_v3, %v42_v2  ;;  %vm58_vm0 = vcmask 261120   ;;  %v351_v5 = vld [vmem:[%s500_s3] ss:$0 sm:$0xff]  ;;  %vm78_vm1 = vcmask 523264  }
   0x4   :  { %v399_v14 = vmov 64.0   ;;  %v344_v31 = vld [vmem:[%s499_s2 + $0x18] sm:$0xff]  ;;  %v343_v32 = vld [vmem:[%s499_s2 + $0x10] sm:$0xff]  ;;  %v342_v33 = vld [vmem:[%s499_s2 + $0x8] sm:$0xff]  ;;  %s402_s21 = smov [#allocation2]   ;;  %s300_s24 = sshll.u32 %s502_s5, 4  ;;  %s301_s24 = int_to_ptr.hbm [resolvable:$true] %s300_s24 }
   0x5   :  { %357 = vrcp.f32 %v399_v14  ;;  %169 = vmatpush.bf16.msra.mxu1 %v344_v31  ;;  %v341_v35 = vld [vmem:[%s499_s2] sm:$0xff]  ;;  %s298_s22 = sshll.u32 %s402_s21, 4  ;;  %s299_s22 = int_to_ptr.vmem [resolvable:$true] %s298_s22 }
   0x6   :  { %69 = vmatpush.bf16.msra.mxu0 %v339_v1  ;;  %v352_v54 = vld [vmem:[%s500_s3 + $0x1] ss:$0 sm:$0xff]  ;;  %v353_v59 = vld [vmem:[%s500_s3 + $0x2] ss:$0 sm:$0xff]  ;;  %v354_v1 = vld [vmem:[%s501_s4] ss:$0 sm:$0xff] }
   0x9   :  { %317 = vmatmul.msk.bf16.vlgmr.msra.gmra.mxu0 %vm58_vm0, %v44_v4  ;;  %170 = vmatpush.bf16.msra.mxu1 %v343_v32  ;;  %v401_v32 = vmov 0  }
   0xa   :  { %349 = vset.pattern.permute.xlu2 %v401_v32  ;;  %350 = vset.pattern.permute.xlu0 %v401_v32 }
   0xb   :  { %v358_v15 = vpop.eup %357 }
   0xc   :  { %v86_v16 = vmul.f32 64.0, %v358_v15  ;;  %vm90_vm2 = vweird.f32 %v358_v15 }
   0xd   :  { %171 = vmatpush.bf16.msra.mxu1 %v342_v33 }
   0xe   :  { %v87_v17 = vsub.f32 1.0, %v86_v16 }
  0x10   :  { %v88_v18 = vmul.f32 %v358_v15, %v87_v17 }
  0x11   :  { %172 = vmatpush.bf16.msra.mxu1 %v341_v35 }
  0x12   :  { %v89_v19 = vadd.f32 %v358_v15, %v88_v18 }
  0x14   :  { %v91_v20 = vsel %vm90_vm2, %v358_v15, %v89_v19 }
  0x86   :  { %v71_v6 = vpop.f32.mrf.mxu0 }
  0x87   :  { %v72_v7 = vadd.f32 %v351_v5, %v71_v6 }
  0x89   :  { %v76_v8 = vmax.f32 %v72_v7, 0.0 }
  0x8b   :  { %v79_v9 = vsel %vm78_vm1, %v76_v8, 0.0 }
  0x8c   :  { %80 = vadd.xlane.f32.xlu0 %v79_v9  ;;  %v400_v9 = vmov 32.0  }
  0x8e   :  { %v73_v10 = vpop.f32.mrf.mxu0 }
  0x8f   :  { %v74_v11 = vadd.f32 %v351_v5, %v73_v10 }
  0x91   :  { %v77_v12 = vmax.f32 %v74_v11, 0.0 }
  0x93   :  { %v82_v13 = vsel %vm78_vm1, %v77_v12, 0.0 }
  0x94   :  { %83 = vadd.xlane.f32.xlu0 %v82_v13 }
  0xff   :  { %v81_v21 = vpop.xlane.xlu0 %80 }
 0x100   :  { %v92_v22 = vmul.f32 %v91_v20, %v81_v21 }
 0x102   :  { %v94_v23 = vsub.f32 %v76_v8, %v92_v22 }
 0x104   :  { %v96_v24 = vmul.f32 %v94_v23, %v94_v23 }
 0x106   :  { %v98_v25 = vsel %vm78_vm1, %v96_v24, 0.0 }
 0x107   :  { %99 = vadd.xlane.f32.xlu1 %v98_v25  ;;  %v84_v26 = vpop.xlane.xlu0 %83 }
 0x108   :  { %v93_v27 = vmul.f32 %v91_v20, %v84_v26 }
 0x10a   :  { %v95_v28 = vsub.f32 %v77_v12, %v93_v27 }
 0x10c   :  { %v97_v29 = vmul.f32 %v95_v28, %v95_v28 }
 0x10e   :  { %v101_v30 = vsel %vm78_vm1, %v97_v29, 0.0 }
 0x10f   :  { %102 = vadd.xlane.f32.xlu1 %v101_v30  ;;  %v29_v30 = vld [vmem:[%s501_s4 + $0x4] sm:$0x1] }
 0x17a   :  { %v100_v34 = vpop.xlane.xlu1 %99 }
 0x17b   :  { %v104_v36 = vmul.f32 %v100_v34, %v91_v20 }
 0x17d   :  { %v106_v37 = vadd.f32 1e-05, %v104_v36 }
 0x17f   :  { %359 = vrsqrt.f32 %v106_v37  ;;  %vm114_vm4 = vweird.f32 %v106_v37 }
 0x182   :  { %v103_v38 = vpop.xlane.xlu1 %102 }
 0x183   :  { %v105_v39 = vmul.f32 %v103_v38, %v91_v20 }
 0x185   :  { %v360_v40 = vpop.eup %359  ;;  %v107_v41 = vadd.f32 1e-05, %v105_v39 }
 0x186   :  { %v109_v42 = vmul.f32 %v360_v40, %v106_v37  ;;  %vm115_vm3 = vweird.f32 %v360_v40 }
 0x187   :  { %361 = vrsqrt.f32 %v107_v41  ;;  %vm116_vm5 = vmor %vm114_vm4, %vm115_vm3  ;;  %vm124_vm7 = vweird.f32 %v107_v41  ;;  %vm291_vm3 = vcmask 122880  }
 0x188   :  { %v110_v43 = vmul.f32 %v360_v40, %v109_v42  ;;  %363 = vrcp.f32 %v400_v9  ;;  %v355_v42 = vld [vmem:[%s501_s4 + $0x1] ss:$0 sm:$0xff] }
 0x18a   :  { %v111_v44 = vmul.f32 0.5, %v110_v43 }
 0x18c   :  { %v112_v45 = vsub.f32 1.5, %v111_v44 }
 0x18d   :  { %v362_v46 = vpop.eup %361 }
 0x18e   :  { %v113_v47 = vmul.f32 %v360_v40, %v112_v45  ;;  %v119_v48 = vmul.f32 %v362_v46, %v107_v41  ;;  %vm125_vm6 = vweird.f32 %v362_v46  ;;  %v364_v10 = vpop.eup %363 }
 0x18f   :  { %vm126_vm8 = vmor %vm124_vm7, %vm125_vm6  ;;  %v188_v11 = vmul.f32 32.0, %v364_v10  ;;  %vm192_vm9 = vweird.f32 %v364_v10 }
 0x190   :  { %v120_v49 = vmul.f32 %v362_v46, %v119_v48  ;;  %v117_v50 = vsel %vm116_vm5, %v360_v40, %v113_v47 }
 0x191   :  { %v128_v53 = vmul.f32 %v117_v50, %v94_v23  ;;  %v189_v12 = vsub.f32 1.0, %v188_v11 }
 0x192   :  { %v121_v51 = vmul.f32 0.5, %v120_v49 }
 0x193   :  { %v131_v58 = vmul.f32 %v352_v54, %v128_v53  ;;  %v190_v13 = vmul.f32 %v364_v10, %v189_v12 }
 0x194   :  { %v122_v52 = vsub.f32 1.5, %v121_v51 }
 0x195   :  { %v134_v61 = vadd.f32 %v353_v59, %v131_v58  ;;  %v191_v14 = vadd.f32 %v364_v10, %v190_v13 }
 0x196   :  { %v123_v55 = vmul.f32 %v362_v46, %v122_v52 }
 0x197   :  { %v193_v15 = vsel %vm192_vm9, %v364_v10, %v191_v14 }
 0x198   :  { %v127_v56 = vsel %vm126_vm8, %v362_v46, %v123_v55  ;;  %v356_v46 = vld [vmem:[%s501_s4 + $0x2] ss:$0 sm:$0xff] }
 0x199   :  { %v129_v57 = vmul.f32 %v127_v56, %v95_v28  ;;  %v28_v56 = vld [vmem:[%s501_s4 + $0x3] sm:$0x1] }
 0x19b   :  { %v132_v60 = vmul.f32 %v352_v54, %v129_v57 }
 0x19d   :  { %v135_v62 = vadd.f32 %v353_v59, %v132_v60 }
 0x19f   :  { %v136_v63 = vpack.c.bf16 %v135_v62, %v134_v61 }
 0x1a1   :  { %334 = vmatmul.msk.bf16.vlgmr.msra.gmra.mxu1 %vm78_vm1, %v136_v63 }
 0x21e   :  { %v174_v0 = vpop.f32.mrf.mxu1 }
 0x21f   :  { %v175_v5 = vadd.f32 %v354_v1, %v174_v0 }
 0x221   :  { %v179_v7 = vmax.f32 %v175_v5, 0.0 }
 0x223   :  { %v181_v8 = vsel %vm58_vm0, %v179_v7, 0.0 }
 0x226   :  { %v176_v2 = vpop.f32.mrf.mxu1 }
 0x227   :  { %v177_v3 = vadd.f32 %v354_v1, %v176_v2 }
 0x229   :  { %v180_v4 = vmax.f32 %v177_v3, 0.0 }
 0x22b   :  { %v184_v6 = vsel %vm58_vm0, %v180_v4, 0.0 }
 0x22c   :  { %185 = vadd.xlane.f32.xlu2 %v184_v6 }
 0x234   :  { %182 = vadd.xlane.f32.xlu2 %v181_v8 }
 0x24c   :  { %240 = vperm.xlu2 %349, %v29_v30  }
 0x29f   :  { %v186_v16 = vpop.xlane.xlu2 %185 }
 0x2a0   :  { %v195_v17 = vmul.f32 %v193_v15, %v186_v16 }
 0x2a2   :  { %v197_v18 = vsub.f32 %v180_v4, %v195_v17 }
 0x2a4   :  { %v199_v19 = vmul.f32 %v197_v18, %v197_v18 }
 0x2a6   :  { %v203_v20 = vsel %vm58_vm0, %v199_v19, 0.0 }
 0x2a7   :  { %204 = vadd.xlane.f32.xlu0 %v203_v20  ;;  %v183_v21 = vpop.xlane.xlu2 %182 }
 0x2a8   :  { %v194_v22 = vmul.f32 %v193_v15, %v183_v21 }
 0x2aa   :  { %v196_v23 = vsub.f32 %v179_v7, %v194_v22 }
 0x2ac   :  { %v198_v24 = vmul.f32 %v196_v23, %v196_v23 }
 0x2ae   :  { %v200_v25 = vsel %vm58_vm0, %v198_v24, 0.0 }
 0x2af   :  { %201 = vadd.xlane.f32.xlu1 %v200_v25  ;;  %v241_v57 = vpop.permute.xlu2 %240 }
 0x31a   :  { %v205_v26 = vpop.xlane.xlu0 %204 }
 0x31b   :  { %v207_v27 = vmul.f32 %v205_v26, %v193_v15 }
 0x31d   :  { %v209_v28 = vadd.f32 1e-05, %v207_v27 }
 0x31f   :  { %365 = vrsqrt.f32 %v209_v28  ;;  %vm226_vm11 = vweird.f32 %v209_v28 }
 0x322   :  { %v202_v29 = vpop.xlane.xlu1 %201 }
 0x323   :  { %v206_v31 = vmul.f32 %v202_v29, %v193_v15 }
 0x325   :  { %v366_v33 = vpop.eup %365  ;;  %v208_v34 = vadd.f32 1e-05, %v206_v31 }
 0x326   :  { %v221_v35 = vmul.f32 %v366_v33, %v209_v28  ;;  %vm227_vm10 = vweird.f32 %v366_v33 }
 0x327   :  { %367 = vrsqrt.f32 %v208_v34  ;;  %vm228_vm12 = vmor %vm226_vm11, %vm227_vm10  ;;  %vm216_vm14 = vweird.f32 %v208_v34 }
 0x328   :  { %v222_v36 = vmul.f32 %v366_v33, %v221_v35 }
 0x32a   :  { %v223_v37 = vmul.f32 0.5, %v222_v36 }
 0x32c   :  { %v224_v38 = vsub.f32 1.5, %v223_v37 }
 0x32d   :  { %v368_v39 = vpop.eup %367 }
 0x32e   :  { %v225_v40 = vmul.f32 %v366_v33, %v224_v38  ;;  %v211_v41 = vmul.f32 %v368_v39, %v208_v34  ;;  %vm217_vm13 = vweird.f32 %v368_v39 }
 0x32f   :  { %vm218_vm15 = vmor %vm216_vm14, %vm217_vm13 }
 0x330   :  { %v212_v43 = vmul.f32 %v368_v39, %v211_v41  ;;  %v229_v44 = vsel %vm228_vm12, %v366_v33, %v225_v40 }
 0x331   :  { %v231_v45 = vmul.f32 %v229_v44, %v197_v18 }
 0x332   :  { %v213_v47 = vmul.f32 0.5, %v212_v43 }
 0x333   :  { %v234_v48 = vmul.f32 %v355_v42, %v231_v45 }
 0x334   :  { %v214_v49 = vsub.f32 1.5, %v213_v47 }
 0x335   :  { %v237_v50 = vadd.f32 %v356_v46, %v234_v48 }
 0x336   :  { %v215_v51 = vmul.f32 %v368_v39, %v214_v49 }
 0x337   :  { %335 = vmatpush.xpose.msk.msra.mxu2 %vm58_vm0, %v237_v50 }
 0x338   :  { %v219_v52 = vsel %vm218_vm15, %v368_v39, %v215_v51 }
 0x339   :  { %v230_v53 = vmul.f32 %v219_v52, %v196_v23 }
 0x33b   :  { %v233_v54 = vmul.f32 %v355_v42, %v230_v53 }
 0x33d   :  { %v236_v55 = vadd.f32 %v356_v46, %v233_v54 }
 0x33f   :  { %336 = vmatpush.xpose.msk.msra.mxu2 %vm58_vm0, %v236_v55 }
 0x342   :  { %337 = vmatmul.msk.f32.vlgmr.msra.gmra.mxu2 %vm58_vm0, %v28_v56 }
 0x3c5   :  { %v269_v58 = vpop.f32.mrf.mxu2 }
 0x3c6   :  { %v270_v59 = vadd.f32 %v269_v58, %v241_v57 }
 0x3c8   :  { %v338_v60 = vmul.f32 -1.442695, %v270_v59 }
 0x3ca   :  { %369 = vpow2.f32 %v338_v60 }
 0x3d0   :  { %v370_v61 = vpop.eup %369 }
 0x3d1   :  { %v275_v62 = vadd.f32 1.0, %v370_v61 }
 0x3d3   :  { %371 = vrcp.f32 %v275_v62  ;;  %v287_v2 = vand.u32 2147483648, %v275_v62  ;;  %v285_v4 = vand.u32 2147483647, %v275_v62  ;;  %vm281_vm0 = vweird.f32 %v275_v62 }
 0x3d5   :  { %v288_v6 = vor.u32 1.1754944e-38, %v287_v2  ;;  %vm286_vm4 = vcmp.eq.f32.partialorder %v285_v4, 8.507059e+37 }
 0x3d9   :  { %v372_v63 = vpop.eup %371 }
 0x3da   :  { %v277_v0 = vmul.f32 %v372_v63, %v275_v62  ;;  %vm282_vm1 = vweird.f32 %v372_v63 }
 0x3db   :  { %vm283_vm2 = vmor %vm281_vm0, %vm282_vm1 }
 0x3dc   :  { %v278_v1 = vsub.f32 1.0, %v277_v0 }
 0x3de   :  { %v279_v3 = vmul.f32 %v372_v63, %v278_v1 }
 0x3e0   :  { %v280_v5 = vadd.f32 %v372_v63, %v279_v3 }
 0x3e2   :  { %v284_v7 = vsel %vm283_vm2, %v372_v63, %v280_v5 }
 0x3e3   :  { %v289_v8 = vsel %vm286_vm4, %v288_v6, %v284_v7 }
 0x3e4   :  { %292 = vst.msk [vmem:[#allocation2] sm:$0x1] %vm291_vm3, %v289_v8 }
 0x3e5   :  { %303 = dma.vmem_to_hbm [thread:$0]  %s299_s22, 16, %s301_s24, [#allocation3]  }
 0x3e6   :  { %397 = dma.done.wait [#allocation3], 16  }
 0x3e7   :  { %398 = vsyncadd [#allocation3], 4294967280 }
 0x3e8   :  { %308 = vsyncpa [#allocation3], 1 }

</bundles_post_ra>
